<compile_context>
chip_gen: v7x
topology: tpu7x:2x2x1
jax: 0.10.0
libtpu: 0.0.40
codegen_flags: <defaults>
</compile_context>

<pallas_src>
import jax
import jax.numpy as jnp
from jax.experimental import pallas as pl
from jax.experimental.pallas import tpu as pltpu

LANES = 128


# --------------------------------------------------------------------------
# Kernels
# --------------------------------------------------------------------------
def _add_kernel(a_ref, b_ref, o_ref):
    o_ref[...] = a_ref[...] + b_ref[...]


def _cat_dma_kernel(a_ref, b_ref, o_ref, sem):
    # Channel concat of contiguous NCHW tensors is two contiguous block copies
    # per batch row; do them as plain HBM->HBM DMAs (no VMEM staging).
    m = a_ref.shape[1]
    n = b_ref.shape[1]
    cp_main = pltpu.make_async_copy(a_ref, o_ref.at[:, pl.ds(0, m)], sem.at[0])
    cp_aux = pltpu.make_async_copy(b_ref, o_ref.at[:, pl.ds(m, n)], sem.at[1])
    cp_main.start()
    cp_aux.start()
    cp_main.wait()
    cp_aux.wait()


# --------------------------------------------------------------------------
# Tiling helpers
# --------------------------------------------------------------------------
def _sublane(dtype):
    # native sublane packing: 8 for 4-byte, 16 for 2-byte, 32 for 1-byte dtypes
    return {1: 32, 2: 16}.get(jnp.dtype(dtype).itemsize, 8)


def _row_tile(rows, width, dtype, *, block_bytes=2 << 20, min_steps=4):
    """Byte-capped, sublane-aligned row tile.

    ~block_bytes per block (so 3 arrays x 2 pipeline buffers fit default scoped
    VMEM on v5e/v6e/v7x) while keeping >= min_steps grid steps for megacore
    sharding on v7x.  Ragged last blocks are left to Pallas' masking.
    """
    sub = _sublane(dtype)
    if rows <= sub:
        return rows                                      # full-extent block
    itemsize = jnp.dtype(dtype).itemsize
    row_bytes = max(1, width * itemsize)
    cap_bytes = max(sub, (block_bytes // row_bytes) // sub * sub)
    cap_steps = (((rows + min_steps - 1) // min_steps) + sub - 1) // sub * sub
    tile = max(sub, min(cap_bytes, cap_steps))
    return rows if tile >= rows else tile


# --------------------------------------------------------------------------
# Pallas wrappers
# --------------------------------------------------------------------------
@jax.jit
def skip_connect_add_pallas(x_main, x_aux):
    assert x_main.shape == x_aux.shape and x_main.dtype == x_aux.dtype
    shape, dtype = x_main.shape, x_main.dtype
    itemsize = jnp.dtype(dtype).itemsize
    n = x_main.size

    # Zero-copy 2-D view: lane-dense 128-wide slab when possible, otherwise a
    # full-extent last dim (legal BlockSpec without any pad/slice copies).
    width = LANES if n % LANES == 0 else shape[-1]
    rows = n // width
    a = x_main.reshape(rows, width)          # metadata-only on contiguous data
    b = x_aux.reshape(rows, width)

    tile = _row_tile(rows, width, dtype)
    grid = (pl.cdiv(rows, tile),)            # ragged last block masked by Pallas
    spec = pl.BlockSpec((tile, width), lambda i: (i, 0))

    out = pl.pallas_call(
        _add_kernel,
        out_shape=jax.ShapeDtypeStruct((rows, width), dtype),
        grid=grid,
        in_specs=[spec, spec],
        out_specs=spec,
        cost_estimate=pl.CostEstimate(flops=n, transcendentals=0,
                                      bytes_accessed=3 * n * itemsize),
        compiler_params=pltpu.CompilerParams(
            dimension_semantics=("parallel",)),
    )(a, b)
    return out.reshape(shape)


@jax.jit
def skip_connect_cat_pallas(x_main, x_aux):
    B, C1, T, F = x_main.shape
    Ba, C2, Ta, Fa = x_aux.shape
    assert (B, T, F) == (Ba, Ta, Fa) and x_main.dtype == x_aux.dtype
    dtype = x_main.dtype
    itemsize = jnp.dtype(dtype).itemsize
    M, N = C1 * T * F, C2 * T * F

    a = x_main.reshape(B, M)                 # metadata-only (contiguous NCHW)
    b = x_aux.reshape(B, N)

    out = pl.pallas_call(
        _cat_dma_kernel,
        out_shape=jax.ShapeDtypeStruct((B, M + N), dtype),
        in_specs=[pl.BlockSpec(memory_space=pl.ANY),
                  pl.BlockSpec(memory_space=pl.ANY)],
        out_specs=pl.BlockSpec(memory_space=pl.ANY),
        scratch_shapes=[pltpu.SemaphoreType.DMA((2,))],
        cost_estimate=pl.CostEstimate(flops=0, transcendentals=0,
                                      bytes_accessed=2 * B * (M + N) * itemsize),
    )(a, b)
    return out.reshape(B, C1 + C2, T, F)


def skip_connect(x_main, x_aux, connect, *, min_pallas_elems=65536):
    """Faithful forward of SkipConnect(connect).

    For tiny framewise tensors the fixed pallas_call launch + glue dominates a
    purely memory-bound op, so those bypass Pallas and let XLA fuse them.
    """
    if connect == 'add':
        if x_main.size < min_pallas_elems:
            return x_main + x_aux
        return skip_connect_add_pallas(x_main, x_aux)
    elif connect == 'cat':
        if x_main.size + x_aux.size < min_pallas_elems:
            return jnp.concatenate((x_main, x_aux), axis=1)
        return skip_connect_cat_pallas(x_main, x_aux)
    else:
        raise ValueError(f'Unsupported intra_connect type: {connect}')


# --------------------------------------------------------------------------
# Self-test
# --------------------------------------------------------------------------
if __name__ == "__main__":
    key = jax.random.PRNGKey(0)
    k1, k2, k3, k4 = jax.random.split(key, 4)

    def check(out, ref, name):
        out = jax.block_until_ready(out)
        assert out.shape == ref.shape and out.dtype == ref.dtype, (name, out.shape)
        err = float(jnp.max(jnp.abs(out - ref)))
        assert err == 0.0, f"{name} max abs err {err}"

    # --- EaBNet framewise-style small shapes (run the Pallas kernels) ------
    B, C, T, F = 2, 4, 8, 16
    x_main = jax.random.normal(k1, (B, C, T, F), jnp.float32)
    x_aux = jax.random.normal(k2, (B, C, T, F), jnp.float32)

    check(skip_connect_add_pallas(x_main, x_aux), x_main + x_aux, "add/small")
    check(skip_connect_cat_pallas(x_main, x_aux),
          jnp.concatenate((x_main, x_aux), axis=1), "cat/small")

    # Dispatcher keeps the module semantics (bypasses Pallas at this tiny size).
    check(skip_connect(x_main, x_aux, 'add'), x_main + x_aux, "add/dispatch")
    check(skip_connect(x_main, x_aux, 'cat'),
          jnp.concatenate((x_main, x_aux), axis=1), "cat/dispatch")

    # --- multi-step grid with a ragged (masked) last row block -------------
    xm = jax.random.normal(k3, (2, 10, 50, 128), jnp.float32)
    xa = jax.random.normal(k4, (2, 10, 50, 128), jnp.float32)
    check(skip_connect_add_pallas(xm, xa), xm + xa, "add/ragged")

    # --- non-128-multiple last dim (F=161 STFT-ish) + asymmetric channels ---
    xm2 = jax.random.normal(k3, (2, 3, 8, 161), jnp.float32)
    xa2 = jax.random.normal(k4, (2, 5, 8, 161), jnp.float32)
    check(skip_connect_add_pallas(xm2, xm2), xm2 + xm2, "add/non128")
    check(skip_connect_cat_pallas(xm2, xa2),
          jnp.concatenate((xm2, xa2), axis=1), "cat/non128")

    print("KERNEL_OK")
</pallas_src>

<mosaic_0001>
module attributes {stable_mosaic.version = 11 : i64} {
  func.func @_add_kernel(%arg0: i32, %arg1: memref<8x128xf32, #tpu.memory_space<vmem>>, %arg2: memref<8x128xf32, #tpu.memory_space<vmem>>, %arg3: memref<8x128xf32, #tpu.memory_space<vmem>>) attributes {dimension_semantics = [#tpu.dimension_semantics<parallel>], iteration_bounds = array<i64: 1>, scalar_prefetch = 0 : i64, scratch_operands = 0 : i64, tpu.core_type = #tpu.core_type<tc>, window_params = [{transform_indices = @transform_0, window_bounds = array<i64: 8, 128>}, {transform_indices = @transform_1, window_bounds = array<i64: 8, 128>}, {transform_indices = @transform_2, window_bounds = array<i64: 8, 128>}]} {
    %c0 = arith.constant 0 : index
    %c0_0 = arith.constant 0 : index
    %0 = vector.load %arg1[%c0, %c0_0] : memref<8x128xf32, #tpu.memory_space<vmem>>, vector<8x128xf32>
    %c0_1 = arith.constant 0 : index
    %c0_2 = arith.constant 0 : index
    %1 = vector.load %arg2[%c0_1, %c0_2] : memref<8x128xf32, #tpu.memory_space<vmem>>, vector<8x128xf32>
    %2 = arith.addf %0, %1 : vector<8x128xf32>
    %c0_3 = arith.constant 0 : index
    %c0_4 = arith.constant 0 : index
    %3 = vector.load %arg3[%c0_3, %c0_4] : memref<8x128xf32, #tpu.memory_space<vmem>>, vector<8x128xf32>
    tpu.vector_store %arg3[%c0_3, %c0_4], %2 {strides = array<i32>} : memref<8x128xf32, #tpu.memory_space<vmem>>, vector<8x128xf32>,
    return
  }
  func.func @transform_0(%arg0: i32) -> (i32, i32) {
    %c0_i32 = arith.constant 0 : i32
    %c0_i32_0 = arith.constant 0 : i32
    return %arg0, %c0_i32 : i32, i32
  }
  func.func @transform_1(%arg0: i32) -> (i32, i32) {
    %c0_i32 = arith.constant 0 : i32
    %c0_i32_0 = arith.constant 0 : i32
    return %arg0, %c0_i32 : i32, i32
  }
  func.func @transform_2(%arg0: i32) -> (i32, i32) {
    %c0_i32 = arith.constant 0 : i32
    %c0_i32_0 = arith.constant 0 : i32
    return %arg0, %c0_i32 : i32, i32
  }
}

</mosaic_0001>

<bundles_post_ra>
// kernel: skip_connect_add_pallas.1
= control target key start
LH: loop header
LB: loop body
LE: loop exit
PB: predicated region body
PF: predicated region fallthrough
CT: control target
= control target key end

     0   :  { %s43_s0 = inlined_call_operand.vmem [shape: f32[8,128], index: 0, kind: input, shape index: {}]   ;;  %s44_s1 = inlined_call_operand.vmem [shape: f32[8,128], index: 1, kind: input, shape index: {}]   ;;  %s45_s2 = inlined_call_operand.vmem [shape: f32[8,128], index: 2, kind: output, shape index: {}]  }
   0x1   :  { %v11_v0 = vld [vmem:[%s43_s0] sm:$0xff] }
   0x2   :  { %v12_v1 = vld [vmem:[%s44_s1] sm:$0xff] }
   0x3   :  { %v13_v2 = vadd.f32 %v12_v1, %v11_v0 }
   0x5   :  { %14 = vst [vmem:[%s45_s2] sm:$0xff] %v13_v2 }

</bundles_post_ra>
